<compile_context>
chip_gen: v7x
topology: tpu7x:2x2x1
jax: 0.10.0
libtpu: 0.0.40
codegen_flags: <defaults>
</compile_context>

<pallas_src>
import math
from functools import partial

import jax
import jax.numpy as jnp
from jax.experimental import pallas as pl
from jax.experimental.pallas import tpu as pltpu


# ----------------------------------------------------------------------------
# Kernel
# ----------------------------------------------------------------------------
def _noisy_mlp_kernel(x_ref, w1_ref, b1_ref, w2_ref, b2_ref, w3_ref, b3_ref,
                      o_ref):
    # x tile: (TM, state_dim) in mm_dtype; weights (noise pre-folded) are
    # resident in VMEM across all batch tiles (constant index_maps).
    h1 = jnp.dot(x_ref[...], w1_ref[...], preferred_element_type=jnp.float32)
    h1 = jnp.maximum(h1 + b1_ref[...], 0.0)

    h2 = jnp.dot(h1.astype(w2_ref.dtype), w2_ref[...],
                 preferred_element_type=jnp.float32)
    h2 = jnp.maximum(h2 + b2_ref[...], 0.0)

    y = jnp.dot(h2.astype(w3_ref.dtype), w3_ref[...],
                preferred_element_type=jnp.float32)
    o_ref[...] = (y + b3_ref[...]).astype(o_ref.dtype)


# ----------------------------------------------------------------------------
# Helpers
# ----------------------------------------------------------------------------
def _round_up(x, m):
    return ((x + m - 1) // m) * m


def _pad2(a, rows, cols):
    return jnp.pad(a, ((0, rows - a.shape[0]), (0, cols - a.shape[1])))


def _choose_tm(batch):
    # Big tiles amortize the ~0.35us per-grid-step overhead; but keep >=2 grid
    # steps for mid/large batches so v7x's two TensorCores both get work, and
    # never round a small batch up by more than 7 rows of wasted compute.
    if batch >= 1024:
        return 512
    if batch >= 256:
        return _round_up((batch + 1) // 2, 8)
    return _round_up(max(batch, 1), 8)


# ----------------------------------------------------------------------------
# Wrapper
# ----------------------------------------------------------------------------
@partial(jax.jit, static_argnames=("training", "mm_dtype"))
def noisy_qnetwork_mlp_forward(x, params, *, training=True,
                               mm_dtype=jnp.bfloat16):
    """Fused 3-layer NoisyQNetworkMLP forward in one batch-tiled Pallas call.

    mm_dtype: dtype of the matmul operands (bf16 default = native MXU path on
    v5e/v6e/v7x; accumulation and bias/ReLU stay f32).  Use jnp.float32 for a
    bit-tight match against an f32 reference.
    """
    batch, state_dim = x.shape
    hidden_dim = params["w1"].shape[1]
    action_dim = params["w3_mu"].shape[1]

    # Lane-dense padded output-feature dims (multiples of 128).  The x feature
    # dim is NOT padded: a full-extent last block dim is legal and avoids an
    # inflated x DMA.
    Hp = _round_up(hidden_dim, 128)
    Ap = _round_up(action_dim, 128)

    TM = _choose_tm(batch)
    Bp = _round_up(batch, TM)

    # Fold the noise once per forward (training mode, matching the PyTorch
    # module's default).  Noise is shared across the batch, so this is exact.
    if training:
        w2 = params["w2_mu"] + params["w2_sigma"] * params["w2_eps"]
        b2 = params["b2_mu"] + params["b2_sigma"] * params["b2_eps"]
        w3 = params["w3_mu"] + params["w3_sigma"] * params["w3_eps"]
        b3 = params["b3_mu"] + params["b3_sigma"] * params["b3_eps"]
    else:
        w2, b2 = params["w2_mu"], params["b2_mu"]
        w3, b3 = params["w3_mu"], params["b3_mu"]

    # x: pad only the batch dim (at most TM-1 <= 7 rows for small batches).
    xp = jnp.pad(x, ((0, Bp - batch), (0, 0))).astype(mm_dtype)
    # Fold + pad + cast fuse into one producer pass per weight under jit.
    # Padded rows/cols are zero, so the retained region is exact.
    w1p = _pad2(params["w1"], state_dim, Hp).astype(mm_dtype)
    w2p = _pad2(w2, Hp, Hp).astype(mm_dtype)
    w3p = _pad2(w3, Hp, Ap).astype(mm_dtype)
    b1p = _pad2(params["b1"], 1, Hp).astype(jnp.float32)
    b2p = _pad2(b2, 1, Hp).astype(jnp.float32)
    b3p = _pad2(b3, 1, Ap).astype(jnp.float32)

    grid = (Bp // TM,)

    flops = 2 * Bp * (state_dim * Hp + Hp * Hp + Hp * Ap)
    bytes_accessed = sum(int(a.size) * a.dtype.itemsize
                         for a in (xp, w1p, b1p, w2p, b2p, w3p, b3p))
    bytes_accessed += Bp * Ap * 4  # output writes

    out = pl.pallas_call(
        _noisy_mlp_kernel,
        out_shape=jax.ShapeDtypeStruct((Bp, Ap), jnp.float32),
        grid_spec=pl.GridSpec(
            grid=grid,
            in_specs=[
                pl.BlockSpec((TM, state_dim), lambda i: (i, 0)),  # x: batch-tiled
                pl.BlockSpec((state_dim, Hp), lambda i: (0, 0)),  # W1: resident
                pl.BlockSpec((1, Hp), lambda i: (0, 0)),          # b1
                pl.BlockSpec((Hp, Hp), lambda i: (0, 0)),         # W2 (noise folded)
                pl.BlockSpec((1, Hp), lambda i: (0, 0)),          # b2 (noise folded)
                pl.BlockSpec((Hp, Ap), lambda i: (0, 0)),         # W3 (noise folded)
                pl.BlockSpec((1, Ap), lambda i: (0, 0)),          # b3 (noise folded)
            ],
            out_specs=pl.BlockSpec((TM, Ap), lambda i: (i, 0)),
        ),
        compiler_params=pltpu.CompilerParams(
            dimension_semantics=("parallel",),
        ),
        cost_estimate=pl.CostEstimate(
            flops=flops, transcendentals=0, bytes_accessed=bytes_accessed),
    )(xp, w1p, b1p, w2p, b2p, w3p, b3p)

    return out[:batch, :action_dim]


# ----------------------------------------------------------------------------
# Deterministic parameter construction (mirrors reset_parameters/reset_noise)
# ----------------------------------------------------------------------------
def _scale_noise(key, size):
    e = jax.random.normal(key, (size,), dtype=jnp.float32)
    return jnp.sign(e) * jnp.sqrt(jnp.abs(e))


def make_params(key, state_dim, action_dim, hidden_dim=128, std_init=0.5):
    ks = jax.random.split(key, 12)

    # fc1: plain nn.Linear(state_dim, hidden_dim); stored as (in, out).
    bound1 = 1.0 / math.sqrt(state_dim)
    w1 = jax.random.uniform(ks[0], (state_dim, hidden_dim), jnp.float32,
                            -bound1, bound1)
    b1 = jax.random.uniform(ks[1], (1, hidden_dim), jnp.float32,
                            -bound1, bound1)

    def noisy_layer(kw, kb, kin, kout, kbias, in_dim, out_dim):
        mu_range = 1.0 / math.sqrt(in_dim)
        w_mu = jax.random.uniform(kw, (in_dim, out_dim), jnp.float32,
                                  -mu_range, mu_range)
        w_sigma = jnp.full((in_dim, out_dim),
                           std_init / math.sqrt(in_dim), jnp.float32)
        b_mu = jax.random.uniform(kb, (1, out_dim), jnp.float32,
                                  -mu_range, mu_range)
        b_sigma = jnp.full((1, out_dim),
                           std_init / math.sqrt(out_dim), jnp.float32)
        eps_in = _scale_noise(kin, in_dim)
        eps_out = _scale_noise(kout, out_dim)
        # torch: weight_epsilon = eps_out.ger(eps_in), shape (out, in);
        # stored transposed (in, out) to match the (in, out) weight layout.
        w_eps = jnp.outer(eps_in, eps_out)
        # Spec's reset_noise draws bias_epsilon independently (scale_noise(out)).
        b_eps = _scale_noise(kbias, out_dim).reshape(1, out_dim)
        return w_mu, w_sigma, w_eps, b_mu, b_sigma, b_eps

    (w2_mu, w2_sigma, w2_eps, b2_mu, b2_sigma, b2_eps) = noisy_layer(
        ks[2], ks[3], ks[4], ks[5], ks[6], hidden_dim, hidden_dim)
    (w3_mu, w3_sigma, w3_eps, b3_mu, b3_sigma, b3_eps) = noisy_layer(
        ks[7], ks[8], ks[9], ks[10], ks[11], hidden_dim, action_dim)

    return dict(
        w1=w1, b1=b1,
        w2_mu=w2_mu, w2_sigma=w2_sigma, w2_eps=w2_eps,
        b2_mu=b2_mu, b2_sigma=b2_sigma, b2_eps=b2_eps,
        w3_mu=w3_mu, w3_sigma=w3_sigma, w3_eps=w3_eps,
        b3_mu=b3_mu, b3_sigma=b3_sigma, b3_eps=b3_eps,
    )


def reference_forward(x, p):
    """Pure-JAX f32 reference of the same math, for correctness checking."""
    hi = jax.lax.Precision.HIGHEST
    h1 = jnp.maximum(jnp.dot(x, p["w1"], precision=hi) + p["b1"], 0.0)
    w2 = p["w2_mu"] + p["w2_sigma"] * p["w2_eps"]
    b2 = p["b2_mu"] + p["b2_sigma"] * p["b2_eps"]
    h2 = jnp.maximum(jnp.dot(h1, w2, precision=hi) + b2, 0.0)
    w3 = p["w3_mu"] + p["w3_sigma"] * p["w3_eps"]
    b3 = p["b3_mu"] + p["b3_sigma"] * p["b3_eps"]
    return jnp.dot(h2, w3, precision=hi) + b3


if __name__ == "__main__":
    key = jax.random.PRNGKey(0)
    k_param, k_x = jax.random.split(key)

    batch, state_dim, action_dim, hidden_dim = 8, 16, 4, 32
    params = make_params(k_param, state_dim, action_dim, hidden_dim)
    x = jax.random.normal(k_x, (batch, state_dim), dtype=jnp.float32)

    ref = reference_forward(x, params)

    # Default bf16-operand path (peak MXU on all generations, f32 accumulation).
    out_bf16 = noisy_qnetwork_mlp_forward(x, params)
    out_bf16 = jax.block_until_ready(out_bf16)
    assert out_bf16.shape == (batch, action_dim)
    assert jnp.allclose(out_bf16, ref, atol=5e-2, rtol=5e-2), \
        "bf16 kernel mismatch vs reference"

    # f32-operand path for a tight numerical check.
    out_f32 = noisy_qnetwork_mlp_forward(x, params, mm_dtype=jnp.float32)
    out_f32 = jax.block_until_ready(out_f32)
    assert jnp.allclose(out_f32, ref, atol=1e-3, rtol=1e-3), \
        "f32 kernel mismatch vs reference"

    print("KERNEL_OK")
</pallas_src>

<mosaic_0001>
module attributes {stable_mosaic.version = 11 : i64} {
  func.func @_noisy_mlp_kernel(%arg0: i32, %arg1: memref<8x16xbf16, #tpu.memory_space<vmem>>, %arg2: memref<16x128xbf16, #tpu.memory_space<vmem>>, %arg3: memref<1x128xf32, #tpu.memory_space<vmem>>, %arg4: memref<128x128xbf16, #tpu.memory_space<vmem>>, %arg5: memref<1x128xf32, #tpu.memory_space<vmem>>, %arg6: memref<128x128xbf16, #tpu.memory_space<vmem>>, %arg7: memref<1x128xf32, #tpu.memory_space<vmem>>, %arg8: memref<8x128xf32, #tpu.memory_space<vmem>>) attributes {dimension_semantics = [#tpu.dimension_semantics<parallel>], iteration_bounds = array<i64: 1>, scalar_prefetch = 0 : i64, scratch_operands = 0 : i64, tpu.core_type = #tpu.core_type<tc>, window_params = [{transform_indices = @transform_0, window_bounds = array<i64: 8, 16>}, {pipeline_mode = #tpu.pipeline_mode<synchronous>, transform_indices = @transform_1, window_bounds = array<i64: 16, 128>}, {pipeline_mode = #tpu.pipeline_mode<synchronous>, transform_indices = @transform_2, window_bounds = array<i64: 1, 128>}, {pipeline_mode = #tpu.pipeline_mode<synchronous>, transform_indices = @transform_3, window_bounds = array<i64: 128, 128>}, {pipeline_mode = #tpu.pipeline_mode<synchronous>, transform_indices = @transform_4, window_bounds = array<i64: 1, 128>}, {pipeline_mode = #tpu.pipeline_mode<synchronous>, transform_indices = @transform_5, window_bounds = array<i64: 128, 128>}, {pipeline_mode = #tpu.pipeline_mode<synchronous>, transform_indices = @transform_6, window_bounds = array<i64: 1, 128>}, {transform_indices = @transform_7, window_bounds = array<i64: 8, 128>}]} {
    %c0 = arith.constant 0 : index
    %c0_0 = arith.constant 0 : index
    %0 = vector.load %arg1[%c0, %c0_0] : memref<8x16xbf16, #tpu.memory_space<vmem>>, vector<8x16xbf16>
    %c0_1 = arith.constant 0 : index
    %c0_2 = arith.constant 0 : index
    %1 = vector.load %arg2[%c0_1, %c0_2] : memref<16x128xbf16, #tpu.memory_space<vmem>>, vector<16x128xbf16>
    %cst = arith.constant dense<0.000000e+00> : vector<8x128xf32>
    %2 = tpu.matmul %0, %1, %cst {dimension_numbers = #tpu.dot_dimension_numbers<[1], [0], [0], [1], [0, 0, 1, 1], [], []>} : vector<8x16xbf16>, vector<16x128xbf16>, vector<8x128xf32> -> vector<8x128xf32>
    %c0_3 = arith.constant 0 : index
    %c0_4 = arith.constant 0 : index
    %3 = vector.load %arg3[%c0_3, %c0_4] : memref<1x128xf32, #tpu.memory_space<vmem>>, vector<1x128xf32>
    %4 = vector.broadcast %3 : vector<1x128xf32> to vector<8x128xf32>
    %5 = arith.addf %2, %4 : vector<8x128xf32>
    %cst_5 = arith.constant 0.000000e+00 : f32
    %6 = vector.broadcast %cst_5 : f32 to vector<8x128xf32>
    %7 = arith.maximumf %5, %6 : vector<8x128xf32>
    %8 = arith.truncf %7 : vector<8x128xf32> to vector<8x128xbf16>
    %c0_6 = arith.constant 0 : index
    %c0_7 = arith.constant 0 : index
    %9 = vector.load %arg4[%c0_6, %c0_7] : memref<128x128xbf16, #tpu.memory_space<vmem>>, vector<128x128xbf16>
    %cst_8 = arith.constant dense<0.000000e+00> : vector<8x128xf32>
    %10 = tpu.matmul %8, %9, %cst_8 {dimension_numbers = #tpu.dot_dimension_numbers<[1], [0], [0], [1], [0, 0, 1, 1], [], []>} : vector<8x128xbf16>, vector<128x128xbf16>, vector<8x128xf32> -> vector<8x128xf32>
    %c0_9 = arith.constant 0 : index
    %c0_10 = arith.constant 0 : index
    %11 = vector.load %arg5[%c0_9, %c0_10] : memref<1x128xf32, #tpu.memory_space<vmem>>, vector<1x128xf32>
    %12 = vector.broadcast %11 : vector<1x128xf32> to vector<8x128xf32>
    %13 = arith.addf %10, %12 : vector<8x128xf32>
    %cst_11 = arith.constant 0.000000e+00 : f32
    %14 = vector.broadcast %cst_11 : f32 to vector<8x128xf32>
    %15 = arith.maximumf %13, %14 : vector<8x128xf32>
    %16 = arith.truncf %15 : vector<8x128xf32> to vector<8x128xbf16>
    %c0_12 = arith.constant 0 : index
    %c0_13 = arith.constant 0 : index
    %17 = vector.load %arg6[%c0_12, %c0_13] : memref<128x128xbf16, #tpu.memory_space<vmem>>, vector<128x128xbf16>
    %cst_14 = arith.constant dense<0.000000e+00> : vector<8x128xf32>
    %18 = tpu.matmul %16, %17, %cst_14 {dimension_numbers = #tpu.dot_dimension_numbers<[1], [0], [0], [1], [0, 0, 1, 1], [], []>} : vector<8x128xbf16>, vector<128x128xbf16>, vector<8x128xf32> -> vector<8x128xf32>
    %c0_15 = arith.constant 0 : index
    %c0_16 = arith.constant 0 : index
    %19 = vector.load %arg7[%c0_15, %c0_16] : memref<1x128xf32, #tpu.memory_space<vmem>>, vector<1x128xf32>
    %20 = vector.broadcast %19 : vector<1x128xf32> to vector<8x128xf32>
    %21 = arith.addf %18, %20 : vector<8x128xf32>
    %c0_17 = arith.constant 0 : index
    %c0_18 = arith.constant 0 : index
    %22 = vector.load %arg8[%c0_17, %c0_18] : memref<8x128xf32, #tpu.memory_space<vmem>>, vector<8x128xf32>
    tpu.vector_store %arg8[%c0_17, %c0_18], %21 {strides = array<i32>} : memref<8x128xf32, #tpu.memory_space<vmem>>, vector<8x128xf32>,
    return
  }
  func.func @transform_0(%arg0: i32) -> (i32, i32) {
    %c0_i32 = arith.constant 0 : i32
    %c0_i32_0 = arith.constant 0 : i32
    return %arg0, %c0_i32 : i32, i32
  }
  func.func @transform_1(%arg0: i32) -> (i32, i32) {
    %c0_i32 = arith.constant 0 : i32
    %c0_i32_0 = arith.constant 0 : i32
    %c0_i32_1 = arith.constant 0 : i32
    return %c0_i32, %c0_i32_0 : i32, i32
  }
  func.func @transform_2(%arg0: i32) -> (i32, i32) {
    %c0_i32 = arith.constant 0 : i32
    %c0_i32_0 = arith.constant 0 : i32
    %c0_i32_1 = arith.constant 0 : i32
    return %c0_i32, %c0_i32_0 : i32, i32
  }
  func.func @transform_3(%arg0: i32) -> (i32, i32) {
    %c0_i32 = arith.constant 0 : i32
    %c0_i32_0 = arith.constant 0 : i32
    %c0_i32_1 = arith.constant 0 : i32
    return %c0_i32, %c0_i32_0 : i32, i32
  }
  func.func @transform_4(%arg0: i32) -> (i32, i32) {
    %c0_i32 = arith.constant 0 : i32
    %c0_i32_0 = arith.constant 0 : i32
    %c0_i32_1 = arith.constant 0 : i32
    return %c0_i32, %c0_i32_0 : i32, i32
  }
  func.func @transform_5(%arg0: i32) -> (i32, i32) {
    %c0_i32 = arith.constant 0 : i32
    %c0_i32_0 = arith.constant 0 : i32
    %c0_i32_1 = arith.constant 0 : i32
    return %c0_i32, %c0_i32_0 : i32, i32
  }
  func.func @transform_6(%arg0: i32) -> (i32, i32) {
    %c0_i32 = arith.constant 0 : i32
    %c0_i32_0 = arith.constant 0 : i32
    %c0_i32_1 = arith.constant 0 : i32
    return %c0_i32, %c0_i32_0 : i32, i32
  }
  func.func @transform_7(%arg0: i32) -> (i32, i32) {
    %c0_i32 = arith.constant 0 : i32
    %c0_i32_0 = arith.constant 0 : i32
    return %arg0, %c0_i32 : i32, i32
  }
}

</mosaic_0001>

<bundles_post_ra>
// kernel: mul.6
= control target key start
LH: loop header
LB: loop body
LE: loop exit
PB: predicated region body
PF: predicated region fallthrough
CT: control target
= control target key end

     0   :  { %s34_s0 = inlined_call_operand.vmem [shape: f32[32,4], index: 0, kind: input, shape index: {}]   ;;  %s35_s1 = inlined_call_operand.vmem [shape: f32[32,4], index: 1, kind: input, shape index: {}]   ;;  %s36_s2 = inlined_call_operand.vmem [shape: f32[32,4], index: 2, kind: output, shape index: {}]  }
   0x1   :  { %v3_v0 = vld [vmem:[%s34_s0] sm:$0xf] }
   0x2   :  { %v4_v1 = vld [vmem:[%s35_s1] sm:$0xf] }
   0x3   :  { %v7_v2 = vmul.f32 %v4_v1, %v3_v0 }
   0x5   :  { %9 = vst [vmem:[%s36_s2] sm:$0xf] %v7_v2 }

// kernel: noisy_qnetwork_mlp_forward.1
= control target key start
LH: loop header
LB: loop body
LE: loop exit
PB: predicated region body
PF: predicated region fallthrough
CT: control target
= control target key end

     0   :  { %v424_v0 = vmov 0.0   ;;  %vm425_vm0 = vmmov 0   ;;  %vm43_vm1 = vcmask 130048   ;;  %s552_s1 = inlined_call_operand.vmem [shape: bf16[16,128], index: 1, kind: input, shape index: {}]   ;;  %s553_s0 = inlined_call_operand.vmem [shape: bf16[8,16], index: 0, kind: input, shape index: {}]   ;;  %s554_s3 = inlined_call_operand.vmem [shape: bf16[128,128], index: 3, kind: input, shape index: {}]   ;;  %s555_s5 = inlined_call_operand.vmem [shape: bf16[128,128], index: 5, kind: input, shape index: {}]   ;;  %s556_s2 = inlined_call_operand.vmem [shape: f32[1,128], index: 2, kind: input, shape index: {}]   ;;  %s557_s4 = inlined_call_operand.vmem [shape: f32[1,128], index: 4, kind: input, shape index: {}]   ;;  %s558_s6 = inlined_call_operand.vmem [shape: f32[1,128], index: 6, kind: input, shape index: {}]   ;;  %s559_s7 = inlined_call_operand.vmem [shape: f32[8,128], index: 7, kind: output, shape index: {}]  }
   0x1   :  { %359 = vmatprep.subr.bf16.mxu0 %v424_v0  ;;  %v407_v1 = vld [vmem:[%s552_s1] sm:$0xff]   ;;  %361 = vmatprep.mubr.msk.bf16.mxu0 %vm425_vm0, %v424_v0  ;;  %v409_v4 = vld [vmem:[%s554_s3 + $0x8] sm:$0xff]   ;;  %v410_v5 = vld [vmem:[%s554_s3 + $0x10] sm:$0xff]  }
   0x2   :  { %v27_v2 = vld [vmem:[%s553_s0] sm:$0xf]  ;;  %365 = vmatprep.subr.bf16.mxu1 %v424_v0  ;;  %381 = vmatprep.mubr.msk.bf16.mxu1 %vm425_vm0, %v424_v0  ;;  %v411_v6 = vld [vmem:[%s554_s3 + $0x18] sm:$0xff]   ;;  %v413_v8 = vld [vmem:[%s554_s3 + $0x28] sm:$0xff]  }
   0x3   :  { %360 = vmatpush3.bf16.msra.mxu0 %v407_v1  ;;  %v408_v3 = vld [vmem:[%s554_s3] sm:$0xff]   ;;  %v414_v9 = vld [vmem:[%s554_s3 + $0x30] sm:$0xff]   ;;  %v415_v10 = vld [vmem:[%s554_s3 + $0x38] sm:$0xff]  }
   0x4   :  { %385 = vmatprep.subr.bf16.mxu0 %v424_v0  ;;  %366 = vmatpush3.bf16.msra.mxu1 %v408_v3  ;;  %v412_v7 = vld [vmem:[%s554_s3 + $0x20] sm:$0xff]   ;;  %v417_v12 = vld [vmem:[%s555_s5 + $0x8] sm:$0xff]   ;;  %v418_v13 = vld [vmem:[%s555_s5 + $0x10] sm:$0xff]  }
   0x5   :  { %367 = vmatprep.subr.bf16.mxu1 %v424_v0  ;;  %v416_v11 = vld [vmem:[%s555_s5] sm:$0xff]   ;;  %v419_v14 = vld [vmem:[%s555_s5 + $0x18] sm:$0xff]   ;;  %v421_v16 = vld [vmem:[%s555_s5 + $0x28] sm:$0xff]  }
   0x6   :  { %362 = vmatmul.mubr.msk.bf16.vlgmr.msra.gmra.mrb[0].mxu0 %vm43_vm1, %v27_v2  ;;  %v420_v15 = vld [vmem:[%s555_s5 + $0x20] sm:$0xff]   ;;  %v422_v25 = vld [vmem:[%s555_s5 + $0x30] sm:$0xff]   ;;  %v423_v26 = vld [vmem:[%s555_s5 + $0x38] sm:$0xff]  }
   0x7   :  { %401 = vmatprep.mubr.msk.bf16.mxu0 %vm425_vm0, %v424_v0  ;;  %386 = vmatpush3.bf16.msra.mxu0 %v416_v11  ;;  %v318_v17 = vld [vmem:[%s556_s2] ss:$0 sm:$0xff] }
   0x8   :  { %368 = vmatpush3.bf16.msra.mxu1 %v409_v4  ;;  %387 = vmatprep.subr.bf16.mxu0 %v424_v0  ;;  %v321_v27 = vld [vmem:[%s557_s4] ss:$0 sm:$0xff] }
   0x9   :  { %369 = vmatprep.subr.bf16.mxu1 %v424_v0  ;;  %v330_v35 = vld [vmem:[%s558_s6] ss:$0 sm:$0xff] }
   0xb   :  { %388 = vmatpush3.bf16.msra.mxu0 %v417_v12 }
   0xc   :  { %370 = vmatpush3.bf16.msra.mxu1 %v410_v5  ;;  %389 = vmatprep.subr.bf16.mxu0 %v424_v0 }
   0xd   :  { %371 = vmatprep.subr.bf16.mxu1 %v424_v0 }
   0xf   :  { %390 = vmatpush3.bf16.msra.mxu0 %v418_v13 }
  0x10   :  { %372 = vmatpush3.bf16.msra.mxu1 %v411_v6  ;;  %391 = vmatprep.subr.bf16.mxu0 %v424_v0 }
  0x11   :  { %373 = vmatprep.subr.bf16.mxu1 %v424_v0 }
  0x13   :  { %392 = vmatpush3.bf16.msra.mxu0 %v419_v14 }
  0x14   :  { %374 = vmatpush3.bf16.msra.mxu1 %v412_v7  ;;  %393 = vmatprep.subr.bf16.mxu0 %v424_v0 }
  0x15   :  { %375 = vmatprep.subr.bf16.mxu1 %v424_v0 }
  0x17   :  { %394 = vmatpush3.bf16.msra.mxu0 %v420_v15 }
  0x18   :  { %376 = vmatpush3.bf16.msra.mxu1 %v413_v8  ;;  %395 = vmatprep.subr.bf16.mxu0 %v424_v0 }
  0x19   :  { %377 = vmatprep.subr.bf16.mxu1 %v424_v0 }
  0x1b   :  { %396 = vmatpush3.bf16.msra.mxu0 %v421_v16 }
  0x1c   :  { %378 = vmatpush3.bf16.msra.mxu1 %v414_v9  ;;  %397 = vmatprep.subr.bf16.mxu0 %v424_v0 }
  0x1d   :  { %379 = vmatprep.subr.bf16.mxu1 %v424_v0 }
  0x1f   :  { %398 = vmatpush3.bf16.msra.mxu0 %v422_v25 }
  0x20   :  { %380 = vmatpush3.bf16.msra.mxu1 %v415_v10  ;;  %399 = vmatprep.subr.bf16.mxu0 %v424_v0 }
  0x23   :  { %400 = vmatpush3.bf16.msra.mxu0 %v423_v26 }
  0xd9   :  { %v81_v18 = vpop.f32.mrb[0].mxu0 }
  0xda   :  { %v82_v19 = vadd.f32 %v318_v17, %v81_v18  ;;  %v363_v20 = vpop.f32.mrb[1].mxu0 }
  0xdb   :  { %v84_v21 = vpop.f32.mrb[2].mxu0 }
  0xdc   :  { %v87_v22 = vmax.f32 %v82_v19, 0.0  ;;  %v364_v23 = vpop.f32.mrb[3].mxu0 }
  0xde   :  { %v88_v24 = vpack.c.bf16 %v87_v22, %v87_v22 }
  0xe0   :  { %382 = vmatmul.mubr.bf16.vlgmr.msra.gmra.mrb[0].mxu1 %v88_v24 }
 0x1b3   :  { %v194_v28 = vpop.f32.mrb[0].mxu1 }
 0x1b4   :  { %v195_v29 = vadd.f32 %v321_v27, %v194_v28  ;;  %v383_v30 = vpop.f32.mrb[1].mxu1 }
 0x1b5   :  { %v197_v31 = vpop.f32.mrb[2].mxu1 }
 0x1b6   :  { %v200_v32 = vmax.f32 %v195_v29, 0.0  ;;  %v384_v33 = vpop.f32.mrb[3].mxu1 }
 0x1b8   :  { %v201_v34 = vpack.c.bf16 %v200_v32, %v200_v32 }
 0x1ba   :  { %402 = vmatmul.mubr.bf16.vlgmr.msra.gmra.mrb[4].mxu0 %v201_v34 }
 0x28d   :  { %v307_v36 = vpop.f32.mrb[4].mxu0 }
 0x28e   :  { %v308_v37 = vadd.f32 %v330_v35, %v307_v36  ;;  %v403_v38 = vpop.f32.mrb[5].mxu0 }
 0x28f   :  { %v310_v39 = vpop.f32.mrb[6].mxu0 }
 0x290   :  { %313 = vst [vmem:[%s559_s7] sm:$0xff] %v308_v37  ;;  %v404_v40 = vpop.f32.mrb[7].mxu0 }

</bundles_post_ra>
